<compile_context>
chip_gen: v6e
topology: v6e:2x2x1
jax: 0.10.0
libtpu: 0.0.40
codegen_flags: <defaults>
</compile_context>

<pallas_src>
import numpy as np
import jax
import jax.numpy as jnp
from jax.experimental import pallas as pl
from jax.experimental.pallas import tpu as pltpu

_MIB = 1024 * 1024


# ----------------------------------------------------------------------------
# Host-side weight construction (deterministic)
# ----------------------------------------------------------------------------
def _adaptive_avg_weights(in_size: int, out_size: int) -> np.ndarray:
    """(out_size, in_size) matrix W with W[o, i] = 1/count over the adaptive window."""
    w = np.zeros((out_size, in_size), dtype=np.float32)
    for o in range(out_size):
        start = (o * in_size) // out_size
        end = -(-((o + 1) * in_size) // out_size)  # ceil((o+1)*in/out)
        w[o, start:end] = 1.0 / float(end - start)
    return w


# ----------------------------------------------------------------------------
# Hardware-aware sizing helpers
# ----------------------------------------------------------------------------
def _vmem_limit_bytes() -> int:
    """Generation-aware scoped-VMEM request (~3/4 of physical VMEM, capped)."""
    phys = 64 * _MIB
    try:
        phys = int(pltpu.get_tpu_info().vmem_capacity_bytes)
    except Exception:
        pass
    return int(max(32 * _MIB, min(phys * 3 // 4, 112 * _MIB)))


def _sublane_pack(dtype) -> int:
    """Rows per packed sublane group for this dtype: 8 f32, 16 bf16, 32 int8."""
    return max(8, 32 // np.dtype(dtype).itemsize)


def _choose_tile_b(b_eff: int, bytes_per_row: int, budget: int, pack: int) -> int:
    """Largest sublane-aligned batch tile that fits the VMEM budget; keeps >=2
    grid steps when the whole batch would otherwise fit in one tile (v7x megacore)."""
    tile = max(1, budget // max(bytes_per_row, 1))
    if tile >= b_eff:
        if b_eff >= 2 * pack:
            half = -(-b_eff // 2)
            return int(min(b_eff, ((half + pack - 1) // pack) * pack))
        return int(b_eff)
    tile = max(pack, (tile // pack) * pack)
    return int(min(tile, b_eff))


# ----------------------------------------------------------------------------
# Kernels
# ----------------------------------------------------------------------------
def _fused_kernel(x_ref, wt_ref, o_ref):
    # x_ref : (TILE_B, HW_eff)        lane-dense input slab
    # wt_ref: (HW_eff, OHOW_eff)      (block-diagonal) kron weight, resident
    # o_ref : (TILE_B, OHOW_eff)      lane-dense output slab
    o_ref[...] = jnp.dot(
        x_ref[...], wt_ref[...], preferred_element_type=jnp.float32
    ).astype(o_ref.dtype)


def _make_two_pass_kernel(tile_b: int, h: int, oh: int, ow: int):
    """Fallback for large spatial sizes: two big 2-D matmuls per batch tile."""

    def kernel(x_ref, wwt_ref, wh_ref, o_ref):
        # x_ref: (tile_b*h, w), wwt_ref: (w, ow), wh_ref: (oh, h), o_ref: (tile_b, oh, ow)
        t = jnp.dot(x_ref[...], wwt_ref[...], preferred_element_type=jnp.float32)
        t = t.reshape(tile_b, h, ow)
        t = jnp.swapaxes(t, 0, 1).reshape(h, tile_b * ow)
        out = jnp.dot(wh_ref[...], t, preferred_element_type=jnp.float32)
        out = jnp.swapaxes(out.reshape(oh, tile_b, ow), 0, 1)
        o_ref[...] = out.astype(o_ref.dtype)

    return kernel


def _fused_call(x2d, wt, tile_b, vmem_limit, cost, single_buffer_weight):
    b_eff, hw_eff = x2d.shape
    ohow_eff = wt.shape[1]
    if single_buffer_weight:
        # Constant index_map -> never re-fetched; single buffer frees VMEM.
        w_spec = pl.BlockSpec((hw_eff, ohow_eff), lambda i: (0, 0),
                              pipeline_mode=pl.Buffered(1))
    else:
        w_spec = pl.BlockSpec((hw_eff, ohow_eff), lambda i: (0, 0))
    return pl.pallas_call(
        _fused_kernel,
        out_shape=jax.ShapeDtypeStruct((b_eff, ohow_eff), x2d.dtype),
        grid_spec=pl.GridSpec(
            grid=(pl.cdiv(b_eff, tile_b),),
            in_specs=[pl.BlockSpec((tile_b, hw_eff), lambda i: (i, 0)), w_spec],
            out_specs=pl.BlockSpec((tile_b, ohow_eff), lambda i: (i, 0)),
        ),
        compiler_params=pltpu.CompilerParams(
            dimension_semantics=("parallel",),
            vmem_limit_bytes=vmem_limit,
        ),
        cost_estimate=cost,
    )(x2d, wt)


# ----------------------------------------------------------------------------
# Public wrapper: InterpolationLayer(size)(x) for NCHW, mode='area'
# ----------------------------------------------------------------------------
def interpolation_layer(x: jax.Array, size) -> jax.Array:
    if isinstance(size, int):
        out_h, out_w = size, size
    else:
        out_h, out_w = int(size[0]), int(size[1])

    n, c, h, w = x.shape
    b = n * c
    hw, ohow = h * w, out_h * out_w
    itemsize = np.dtype(x.dtype).itemsize

    # bf16 inputs keep bf16 weights (native MXU operands, f32 accumulation);
    # f32 inputs keep f32 weights for exact parity with PyTorch.
    # NOTE: bf16 quantizes 1/count slightly (exact for power-of-two windows).
    w_dtype = jnp.bfloat16 if x.dtype == jnp.bfloat16 else jnp.float32
    w_item = np.dtype(w_dtype).itemsize

    wh_np = _adaptive_avg_weights(h, out_h)   # (OH, H)
    ww_np = _adaptive_avg_weights(w, out_w)   # (OW, W)

    vmem_limit = _vmem_limit_bytes()
    fused_weight_limit = vmem_limit // 6      # resident kron weight budget
    pack = _sublane_pack(x.dtype)

    kron_bytes = hw * ohow * w_item
    # per batch row: double-buffered input + output rows, plus f32 matmul result
    fused_row_bytes = 2 * hw * itemsize + 2 * ohow * itemsize + 4 * ohow
    fused_budget = vmem_limit - 2 * kron_bytes - 4 * _MIB
    use_fused = (kron_bytes <= fused_weight_limit
                 and pack * fused_row_bytes <= fused_budget)

    if use_fused:
        # ---------------- fused single-matmul path ----------------
        kron_t = np.ascontiguousarray(np.kron(wh_np, ww_np).T)   # (HW, OHOW)

        # Fold k batch rows into the lane dim when OH*OW < 128 so the output
        # block's last dim is a full 128 lanes (unmasked vst, full MXU width).
        k_fold = 1
        if ohow < 128 and 128 % ohow == 0:
            k = 128 // ohow
            blown = (k * hw) * (k * ohow) * w_item
            row_eff = k * fused_row_bytes
            if (b % k == 0 and blown <= fused_weight_limit
                    and pack * row_eff <= vmem_limit - 2 * blown - 4 * _MIB):
                k_fold = k

        if k_fold > 1:
            wt_np = np.zeros((k_fold * hw, k_fold * ohow), dtype=np.float32)
            for j in range(k_fold):
                wt_np[j * hw:(j + 1) * hw, j * ohow:(j + 1) * ohow] = kron_t
        else:
            wt_np = kron_t
        wt = jnp.asarray(wt_np, dtype=w_dtype)

        b_eff = b // k_fold
        hw_eff, ohow_eff = k_fold * hw, k_fold * ohow
        x2d = x.reshape(b_eff, hw_eff)

        row_bytes = 2 * hw_eff * itemsize + 2 * ohow_eff * itemsize + 4 * ohow_eff
        budget = vmem_limit - 2 * int(wt.size) * w_item - 4 * _MIB
        tile_b = _choose_tile_b(b_eff, row_bytes, budget, pack)

        cost = pl.CostEstimate(
            flops=2 * b_eff * hw_eff * ohow_eff,
            transcendentals=0,
            bytes_accessed=b * (hw + ohow) * itemsize + int(wt.size) * w_item,
        )

        try:
            out2d = jax.block_until_ready(
                _fused_call(x2d, wt, tile_b, vmem_limit, cost,
                            single_buffer_weight=True))
        except Exception:
            # Some Pallas versions reject pl.Buffered(1); retry with the default
            # (double-buffered but never re-fetched) resident weight.
            out2d = _fused_call(x2d, wt, tile_b, vmem_limit, cost,
                                single_buffer_weight=False)

        return out2d.reshape(n, c, out_h, out_w)

    # ---------------- fallback: large spatial, factored two-matmul form ----------------
    # TODO(synk): for extremely large H*W even a single batch row may exceed the
    # VMEM budget; that would require an additional tiling over H.
    wwt = jnp.asarray(np.ascontiguousarray(ww_np.T), dtype=w_dtype)   # (W, OW)
    wh_j = jnp.asarray(wh_np, dtype=w_dtype)                          # (OH, H)
    x2 = x.reshape(b * h, w)

    row_bytes = (2 * hw * itemsize + 2 * ohow * itemsize
                 + 4 * h * out_w      # width-pass result (f32)
                 + 4 * h * out_w      # transposed copy
                 + 4 * ohow)          # height-pass result (f32)
    budget = vmem_limit - 2 * (int(wwt.size) + int(wh_j.size)) * w_item - 4 * _MIB
    tile_b = int(max(1, min(b, budget // max(row_bytes, 1))))
    if tile_b >= b and b >= 2:
        tile_b = -(-b // 2)           # >=2 grid steps for v7x megacore
    if tile_b < b and (tile_b * h) % 8 != 0:
        tile_b = int(min(b, max(8, (tile_b // 8) * 8)))

    kernel = _make_two_pass_kernel(tile_b, h, out_h, out_w)
    cost = pl.CostEstimate(
        flops=2 * b * (hw * out_w + out_h * h * out_w),
        transcendentals=0,
        bytes_accessed=b * (hw + ohow) * itemsize
        + (int(wwt.size) + int(wh_j.size)) * w_item,
    )

    out3d = pl.pallas_call(
        kernel,
        out_shape=jax.ShapeDtypeStruct((b, out_h, out_w), x.dtype),
        grid_spec=pl.GridSpec(
            grid=(pl.cdiv(b, tile_b),),
            in_specs=[
                pl.BlockSpec((tile_b * h, w), lambda i: (i, 0)),
                pl.BlockSpec((w, out_w), lambda i: (0, 0)),
                pl.BlockSpec((out_h, h), lambda i: (0, 0)),
            ],
            out_specs=pl.BlockSpec((tile_b, out_h, out_w), lambda i: (i, 0, 0)),
        ),
        compiler_params=pltpu.CompilerParams(
            dimension_semantics=("parallel",),
            vmem_limit_bytes=vmem_limit,
        ),
        cost_estimate=cost,
    )(x2, wwt, wh_j)

    return out3d.reshape(n, c, out_h, out_w)


# ----------------------------------------------------------------------------
# Pure-JAX reference for checking
# ----------------------------------------------------------------------------
def _reference_area_interp(x: jax.Array, size) -> jax.Array:
    if isinstance(size, int):
        out_h, out_w = size, size
    else:
        out_h, out_w = int(size[0]), int(size[1])
    wh = jnp.asarray(_adaptive_avg_weights(x.shape[2], out_h))
    ww = jnp.asarray(_adaptive_avg_weights(x.shape[3], out_w))
    return jnp.einsum("ph,nchw,qw->ncpq", wh, x.astype(jnp.float32), ww).astype(x.dtype)


if __name__ == "__main__":
    # StyleGAN-like feature map: NCHW, area downsample 16x16 -> 8x8.
    x = jax.random.normal(jax.random.PRNGKey(0), (2, 4, 16, 16), dtype=jnp.float32)
    out = jax.block_until_ready(interpolation_layer(x, (8, 8)))
    assert out.shape == (2, 4, 8, 8), out.shape
    np.testing.assert_allclose(
        np.asarray(out), np.asarray(_reference_area_interp(x, (8, 8))),
        rtol=1e-5, atol=1e-5)

    # Non-divisible adaptive windows (odd output size, OH*OW not lane-aligned).
    x2 = jax.random.normal(jax.random.PRNGKey(1), (1, 8, 16, 16), dtype=jnp.float32)
    out2 = jax.block_until_ready(interpolation_layer(x2, (5, 7)))
    np.testing.assert_allclose(
        np.asarray(out2), np.asarray(_reference_area_interp(x2, (5, 7))),
        rtol=1e-5, atol=1e-5)

    # Batch that exercises >=2 grid steps with a masked partial last block.
    x3 = jax.random.normal(jax.random.PRNGKey(2), (4, 33, 16, 16), dtype=jnp.float32)
    out3 = jax.block_until_ready(interpolation_layer(x3, (8, 8)))
    np.testing.assert_allclose(
        np.asarray(out3), np.asarray(_reference_area_interp(x3, (8, 8))),
        rtol=1e-5, atol=1e-5)

    # bf16 path (bf16 MXU operands, f32 accumulation).
    x4 = jax.random.normal(jax.random.PRNGKey(3), (2, 4, 16, 16), dtype=jnp.bfloat16)
    out4 = jax.block_until_ready(interpolation_layer(x4, (8, 8)))
    ref4 = _reference_area_interp(x4.astype(jnp.float32), (8, 8))
    np.testing.assert_allclose(
        np.asarray(jnp.asarray(out4, dtype=jnp.float32)), np.asarray(ref4),
        rtol=2e-2, atol=2e-2)

    print("KERNEL_OK")
</pallas_src>

<mosaic_0001>
module attributes {stable_mosaic.version = 11 : i64} {
  func.func @_fused_kernel(%arg0: i32, %arg1: memref<4x512xf32, #tpu.memory_space<vmem>>, %arg2: memref<512x128xf32, #tpu.memory_space<vmem>>, %arg3: memref<4x128xf32, #tpu.memory_space<vmem>>) attributes {dimension_semantics = [#tpu.dimension_semantics<parallel>], iteration_bounds = array<i64: 1>, scalar_prefetch = 0 : i64, scratch_operands = 0 : i64, tpu.core_type = #tpu.core_type<tc>, window_params = [{transform_indices = @transform_0, window_bounds = array<i64: 4, 512>}, {pipeline_mode = #tpu.pipeline_mode<synchronous>, transform_indices = @transform_1, window_bounds = array<i64: 512, 128>}, {transform_indices = @transform_2, window_bounds = array<i64: 4, 128>}]} {
    %c0 = arith.constant 0 : index
    %c0_0 = arith.constant 0 : index
    %0 = vector.load %arg1[%c0, %c0_0] : memref<4x512xf32, #tpu.memory_space<vmem>>, vector<4x512xf32>
    %c0_1 = arith.constant 0 : index
    %c0_2 = arith.constant 0 : index
    %1 = vector.load %arg2[%c0_1, %c0_2] : memref<512x128xf32, #tpu.memory_space<vmem>>, vector<512x128xf32>
    %cst = arith.constant dense<0.000000e+00> : vector<4x128xf32>
    %2 = tpu.matmul %0, %1, %cst {dimension_numbers = #tpu.dot_dimension_numbers<[1], [0], [0], [1], [0, 0, 1, 1], [], []>} : vector<4x512xf32>, vector<512x128xf32>, vector<4x128xf32> -> vector<4x128xf32>
    %c0_3 = arith.constant 0 : index
    %c0_4 = arith.constant 0 : index
    %3 = vector.load %arg3[%c0_3, %c0_4] : memref<4x128xf32, #tpu.memory_space<vmem>>, vector<4x128xf32>
    tpu.vector_store %arg3[%c0_3, %c0_4], %2 {strides = array<i32>} : memref<4x128xf32, #tpu.memory_space<vmem>>, vector<4x128xf32>,
    return
  }
  func.func @transform_0(%arg0: i32) -> (i32, i32) {
    %c0_i32 = arith.constant 0 : i32
    %c0_i32_0 = arith.constant 0 : i32
    return %arg0, %c0_i32 : i32, i32
  }
  func.func @transform_1(%arg0: i32) -> (i32, i32) {
    %c0_i32 = arith.constant 0 : i32
    %c0_i32_0 = arith.constant 0 : i32
    %c0_i32_1 = arith.constant 0 : i32
    return %c0_i32, %c0_i32_0 : i32, i32
  }
  func.func @transform_2(%arg0: i32) -> (i32, i32) {
    %c0_i32 = arith.constant 0 : i32
    %c0_i32_0 = arith.constant 0 : i32
    return %arg0, %c0_i32 : i32, i32
  }
}

module attributes {stable_mosaic.version = 11 : i64} {
  func.func @_fused_kernel(%arg0: i32, %arg1: memref<4x512xf32, #tpu.memory_space<vmem>>, %arg2: memref<512x128xf32, #tpu.memory_space<vmem>>, %arg3: memref<4x128xf32, #tpu.memory_space<vmem>>) attributes {dimension_semantics = [#tpu.dimension_semantics<parallel>], iteration_bounds = array<i64: 1>, scalar_prefetch = 0 : i64, scratch_operands = 0 : i64, tpu.core_type = #tpu.core_type<tc>, window_params = [{transform_indices = @transform_0, window_bounds = array<i64: 4, 512>}, {pipeline_mode = #tpu.pipeline_mode<synchronous>, transform_indices = @transform_1, window_bounds = array<i64: 512, 128>}, {transform_indices = @transform_2, window_bounds = array<i64: 4, 128>}]} {
    %c0 = arith.constant 0 : index
    %c0_0 = arith.constant 0 : index
    %0 = vector.load %arg1[%c0, %c0_0] : memref<4x512xf32, #tpu.memory_space<vmem>>, vector<4x512xf32>
    %c0_1 = arith.constant 0 : index
    %c0_2 = arith.constant 0 : index
    %1 = vector.load %arg2[%c0_1, %c0_2] : memref<512x128xf32, #tpu.memory_space<vmem>>, vector<512x128xf32>
    %cst = arith.constant dense<0.000000e+00> : vector<4x128xf32>
    %2 = tpu.matmul %0, %1, %cst {dimension_numbers = #tpu.dot_dimension_numbers<[1], [0], [0], [1], [0, 0, 1, 1], [], []>} : vector<4x512xf32>, vector<512x128xf32>, vector<4x128xf32> -> vector<4x128xf32>
    %c0_3 = arith.constant 0 : index
    %c0_4 = arith.constant 0 : index
    %3 = vector.load %arg3[%c0_3, %c0_4] : memref<4x128xf32, #tpu.memory_space<vmem>>, vector<4x128xf32>
    tpu.vector_store %arg3[%c0_3, %c0_4], %2 {strides = array<i32>} : memref<4x128xf32, #tpu.memory_space<vmem>>, vector<4x128xf32>,
    return
  }
  func.func @transform_0(%arg0: i32) -> (i32, i32) {
    %c0_i32 = arith.constant 0 : i32
    %c0_i32_0 = arith.constant 0 : i32
    return %arg0, %c0_i32 : i32, i32
  }
  func.func @transform_1(%arg0: i32) -> (i32, i32) {
    %c0_i32 = arith.constant 0 : i32
    %c0_i32_0 = arith.constant 0 : i32
    %c0_i32_1 = arith.constant 0 : i32
    return %c0_i32, %c0_i32_0 : i32, i32
  }
  func.func @transform_2(%arg0: i32) -> (i32, i32) {
    %c0_i32 = arith.constant 0 : i32
    %c0_i32_0 = arith.constant 0 : i32
    return %arg0, %c0_i32 : i32, i32
  }
}

</mosaic_0001>

<bundles_post_ra>
// kernel: tpu_custom_call.1
= control target key start
LH: loop header
LB: loop body
LE: loop exit
PB: predicated region body
PF: predicated region fallthrough
CT: control target
= control target key end

     0   :  { %7 = vsyncpa [#allocation3], 0  ;;  %s439_s0 = inlined_call_operand.hbm [shape: f32[4,512], index: 0, kind: input, shape index: {}]   ;;  %s440_s1 = inlined_call_operand.hbm [shape: f32[512,128], index: 1, kind: input, shape index: {}]   ;;  %s441_s2 = inlined_call_operand.hbm [shape: f32[4,128], index: 2, kind: output, shape index: {}]  }
   0x1   :  { %8 = vsyncpa [#allocation6], 0 }
   0x2   :  { %9 = vsyncpa [#allocation4], 0  ;;  %s410_s9 = smov [#allocation2]   ;;  %s411_s11 = smov [#allocation5]  }
   0x3   :  { %s16_s10 = sshll.u32 %s410_s9, 4  ;;  %s25_s12 = sshll.u32 %s411_s11, 4  ;;  %s17_s10 = int_to_ptr.vmem [resolvable:$true] %s16_s10  ;;  %s26_s12 = int_to_ptr.vmem [resolvable:$true] %s25_s12 }
   0x4   :  { %s352_s13 = scalar_lea.vmem %s17_s10, 256  ;;  %p357_p1 = scmp.lt.s32.totalorder %s17_s10, %s17_s10 }
   0x5   :  { %p353_p0 = scmp.ne.s32.totalorder %s17_s10, %s352_s13  ;;  %p358_p2 = scmp.lt.s32.totalorder %s352_s13, %s352_s13 }
   0x7   :  { %p359_p3 = por %p358_p2, %p357_p1 }
   0x9   :  { %p360_p4 = pnand %p359_p3, %p353_p0 }
   0xb   :  { %363 = shalt.err (!%p360_p4)
}
   0xc   :  { %19 = dma.hbm_to_vmem [thread:$0]  %s439_s0, 256, %s17_s10, [#allocation3]  }
   0xd   :  { %s372_s16 = scalar_lea.vmem %s26_s12, 8192  ;;  %p377_p6 = scmp.lt.s32.totalorder %s26_s12, %s26_s12 }
   0xe   :  { %p373_p5 = scmp.ne.s32.totalorder %s26_s12, %s372_s16  ;;  %p378_p7 = scmp.lt.s32.totalorder %s372_s16, %s372_s16 }
  0x10   :  { %p379_p8 = por %p378_p7, %p377_p6 }
  0x12   :  { %p380_p9 = pnand %p379_p8, %p373_p5 }
  0x14   :  { %383 = shalt.err (!%p380_p9)
}
  0x15   :  { %s412_s17 = smov 128   ;;  %s413_s18 = smov 8  }
  0x16   :  { %31 = dma.hbm_to_vmem [thread:$0]  %s440_s1, 8192, %s26_s12, [#allocation6], %s412_s17, %s412_s17, %s413_s18  }
  0x17   :  { %404 = dma.done.wait [#allocation3], 256  }
  0x18   :  { %405 = vsyncadd [#allocation3], 4294967040 }
  0x19   :  { %406 = dma.done.wait [#allocation6], 8192  }
  0x1a   :  { %407 = vsyncadd [#allocation6], 4294959104  ;;  %v71_v0 = vld [vmem:[#allocation5 + $0xf8] sm:$0xff]  ;;  %v70_v4 = vld [vmem:[#allocation5 + $0xf0] sm:$0xff]  ;;  %s414_s0 = smov [#allocation7]  }
  0x1b   :  { %v103_v1 = vld [vmem:[#allocation5 + $0x1f8] sm:$0xff]  ;;  %267 = vmatprep.subr.mxu0 %v71_v0  ;;  %v102_v5 = vld [vmem:[#allocation5 + $0x1f0] sm:$0xff]  ;;  %v69_v8 = vld [vmem:[#allocation5 + $0xe8] sm:$0xff]  ;;  %s257_s1 = sshll.u32 %s414_s0, 4  ;;  %s258_s1 = int_to_ptr.vmem [resolvable:$true] %s257_s1 }
  0x1c   :  { %v55_v2 = vld [vmem:[#allocation5 + $0x78] sm:$0xff]  ;;  %302 = vmatprep.subr.mxu1 %v103_v1  ;;  %v54_v6 = vld [vmem:[#allocation5 + $0x70] sm:$0xff]  ;;  %v101_v9 = vld [vmem:[#allocation5 + $0x1e8] sm:$0xff]  ;;  %s384_s21 = scalar_lea.vmem %s258_s1, 64  ;;  %p389_p11 = scmp.lt.s32.totalorder %s258_s1, %s258_s1 }
  0x1d   :  { %v87_v3 = vld [vmem:[#allocation5 + $0x178] sm:$0xff]  ;;  %268 = vmatpush3.msra.mxu0 %v55_v2  ;;  %v86_v7 = vld [vmem:[#allocation5 + $0x170] sm:$0xff]  ;;  %v53_v10 = vld [vmem:[#allocation5 + $0x68] sm:$0xff]  ;;  %p385_p10 = scmp.ne.s32.totalorder %s258_s1, %s384_s21  ;;  %p390_p12 = scmp.lt.s32.totalorder %s384_s21, %s384_s21 }
  0x1e   :  { %303 = vmatpush3.msra.mxu1 %v87_v3  ;;  %269 = vmatprep.subr.mxu0 %v70_v4  ;;  %v85_v11 = vld [vmem:[#allocation5 + $0x168] sm:$0xff]  ;;  %v68_v12 = vld [vmem:[#allocation5 + $0xe0] sm:$0xff]  ;;  %v67_v16 = vld [vmem:[#allocation5 + $0xd8] sm:$0xff] }
  0x1f   :  { %304 = vmatprep.subr.mxu1 %v102_v5  ;;  %270 = vmatpush3.msra.mxu0 %v54_v6  ;;  %v100_v13 = vld [vmem:[#allocation5 + $0x1e0] sm:$0xff]  ;;  %v99_v17 = vld [vmem:[#allocation5 + $0x1d8] sm:$0xff]  ;;  %v66_v20 = vld [vmem:[#allocation5 + $0xd0] sm:$0xff]  ;;  %p391_p13 = por %p390_p12, %p389_p11 }
  0x20   :  { %305 = vmatpush3.msra.mxu1 %v86_v7  ;;  %271 = vmatprep.subr.mxu0 %v69_v8  ;;  %v52_v14 = vld [vmem:[#allocation5 + $0x60] sm:$0xff]  ;;  %v51_v18 = vld [vmem:[#allocation5 + $0x58] sm:$0xff]  ;;  %v98_v21 = vld [vmem:[#allocation5 + $0x1d0] sm:$0xff] }
  0x21   :  { %306 = vmatprep.subr.mxu1 %v101_v9  ;;  %v84_v15 = vld [vmem:[#allocation5 + $0x160] sm:$0xff]  ;;  %272 = vmatpush3.msra.mxu0 %v53_v10  ;;  %v83_v19 = vld [vmem:[#allocation5 + $0x158] sm:$0xff]  ;;  %v50_v22 = vld [vmem:[#allocation5 + $0x50] sm:$0xff]  ;;  %p392_p0 = pnand %p391_p13, %p385_p10 }
  0x22   :  { %307 = vmatpush3.msra.mxu1 %v85_v11  ;;  %273 = vmatprep.subr.mxu0 %v68_v12  ;;  %v82_v23 = vld [vmem:[#allocation5 + $0x150] sm:$0xff]  ;;  %v65_v24 = vld [vmem:[#allocation5 + $0xc8] sm:$0xff]  ;;  %v64_v28 = vld [vmem:[#allocation5 + $0xc0] sm:$0xff] }
  0x23   :  { %308 = vmatprep.subr.mxu1 %v100_v13  ;;  %274 = vmatpush3.msra.mxu0 %v52_v14  ;;  %v97_v25 = vld [vmem:[#allocation5 + $0x1c8] sm:$0xff]  ;;  %v96_v29 = vld [vmem:[#allocation5 + $0x1c0] sm:$0xff]  ;;  %v63_v32 = vld [vmem:[#allocation5 + $0xb8] sm:$0xff] }
  0x24   :  { %309 = vmatpush3.msra.mxu1 %v84_v15  ;;  %275 = vmatprep.subr.mxu0 %v67_v16  ;;  %v49_v26 = vld [vmem:[#allocation5 + $0x48] sm:$0xff]  ;;  %v48_v30 = vld [vmem:[#allocation5 + $0x40] sm:$0xff]  ;;  %v95_v33 = vld [vmem:[#allocation5 + $0x1b8] sm:$0xff] }
  0x25   :  { %310 = vmatprep.subr.mxu1 %v99_v17  ;;  %276 = vmatpush3.msra.mxu0 %v51_v18  ;;  %v81_v27 = vld [vmem:[#allocation5 + $0x148] sm:$0xff]  ;;  %v80_v31 = vld [vmem:[#allocation5 + $0x140] sm:$0xff]  ;;  %v47_v34 = vld [vmem:[#allocation5 + $0x38] sm:$0xff] }
  0x26   :  { %311 = vmatpush3.msra.mxu1 %v83_v19  ;;  %277 = vmatprep.subr.mxu0 %v66_v20  ;;  %v79_v35 = vld [vmem:[#allocation5 + $0x138] sm:$0xff]  ;;  %v62_v36 = vld [vmem:[#allocation5 + $0xb0] sm:$0xff]  ;;  %v61_v40 = vld [vmem:[#allocation5 + $0xa8] sm:$0xff] }
  0x27   :  { %312 = vmatprep.subr.mxu1 %v98_v21  ;;  %278 = vmatpush3.msra.mxu0 %v50_v22  ;;  %v94_v37 = vld [vmem:[#allocation5 + $0x1b0] sm:$0xff]  ;;  %v93_v41 = vld [vmem:[#allocation5 + $0x1a8] sm:$0xff]  ;;  %v60_v44 = vld [vmem:[#allocation5 + $0xa0] sm:$0xff] }
  0x28   :  { %313 = vmatpush3.msra.mxu1 %v82_v23  ;;  %279 = vmatprep.subr.mxu0 %v65_v24  ;;  %v46_v38 = vld [vmem:[#allocation5 + $0x30] sm:$0xff]  ;;  %v45_v42 = vld [vmem:[#allocation5 + $0x28] sm:$0xff]  ;;  %v92_v45 = vld [vmem:[#allocation5 + $0x1a0] sm:$0xff] }
  0x29   :  { %314 = vmatprep.subr.mxu1 %v97_v25  ;;  %280 = vmatpush3.msra.mxu0 %v49_v26  ;;  %v78_v39 = vld [vmem:[#allocation5 + $0x130] sm:$0xff]  ;;  %v77_v43 = vld [vmem:[#allocation5 + $0x128] sm:$0xff]  ;;  %v44_v46 = vld [vmem:[#allocation5 + $0x20] sm:$0xff] }
  0x2a   :  { %315 = vmatpush3.msra.mxu1 %v81_v27  ;;  %281 = vmatprep.subr.mxu0 %v64_v28  ;;  %v76_v47 = vld [vmem:[#allocation5 + $0x120] sm:$0xff]  ;;  %v59_v48 = vld [vmem:[#allocation5 + $0x98] sm:$0xff]  ;;  %v58_v52 = vld [vmem:[#allocation5 + $0x90] sm:$0xff] }
  0x2b   :  { %316 = vmatprep.subr.mxu1 %v96_v29  ;;  %282 = vmatpush3.msra.mxu0 %v48_v30  ;;  %v91_v49 = vld [vmem:[#allocation5 + $0x198] sm:$0xff]  ;;  %v90_v53 = vld [vmem:[#allocation5 + $0x190] sm:$0xff]  ;;  %v57_v57 = vld [vmem:[#allocation5 + $0x88] sm:$0xff] }
  0x2c   :  { %317 = vmatpush3.msra.mxu1 %v80_v31  ;;  %283 = vmatprep.subr.mxu0 %v63_v32  ;;  %v43_v50 = vld [vmem:[#allocation5 + $0x18] sm:$0xff]  ;;  %v42_v54 = vld [vmem:[#allocation5 + $0x10] sm:$0xff]  ;;  %v89_v58 = vld [vmem:[#allocation5 + $0x188] sm:$0xff] }
  0x2d   :  { %318 = vmatprep.subr.mxu1 %v95_v33  ;;  %284 = vmatpush3.msra.mxu0 %v47_v34  ;;  %v75_v51 = vld [vmem:[#allocation5 + $0x118] sm:$0xff]  ;;  %v74_v55 = vld [vmem:[#allocation5 + $0x110] sm:$0xff]  ;;  %v41_v60 = vld [vmem:[#allocation5 + $0x8] sm:$0xff] }
  0x2e   :  { %319 = vmatpush3.msra.mxu1 %v79_v35  ;;  %285 = vmatprep.subr.mxu0 %v62_v36  ;;  %v38_v56 = vld [vmem:[#allocation2] sm:$0xff]  ;;  %v39_v59 = vld [vmem:[#allocation2 + $0x8] sm:$0xff]  ;;  %v73_v61 = vld [vmem:[#allocation5 + $0x108] sm:$0xff] }
  0x2f   :  { %320 = vmatprep.subr.mxu1 %v94_v37  ;;  %286 = vmatpush3.msra.mxu0 %v46_v38  ;;  %v56_v62 = vld [vmem:[#allocation5 + $0x80] sm:$0xff]  ;;  %v106_v0 = vcombine.high %v38_v56, %v38_v56  ;;  %v107_v2 = vcombine.high %v39_v59, %v39_v59 }
  0x30   :  { %321 = vmatpush3.msra.mxu1 %v78_v39  ;;  %287 = vmatprep.subr.mxu0 %v61_v40  ;;  %v88_v63 = vld [vmem:[#allocation5 + $0x180] sm:$0xff] }
  0x31   :  { %322 = vmatprep.subr.mxu1 %v93_v41  ;;  %288 = vmatpush3.msra.mxu0 %v45_v42  ;;  %v40_v1 = vld [vmem:[#allocation5] sm:$0xff] }
  0x32   :  { %323 = vmatpush3.msra.mxu1 %v77_v43  ;;  %289 = vmatprep.subr.mxu0 %v60_v44  ;;  %v72_v3 = vld [vmem:[#allocation5 + $0x100] sm:$0xff] }
  0x33   :  { %324 = vmatprep.subr.mxu1 %v92_v45  ;;  %290 = vmatpush3.msra.mxu0 %v44_v46 }
  0x34   :  { %325 = vmatpush3.msra.mxu1 %v76_v47  ;;  %291 = vmatprep.subr.mxu0 %v59_v48 }
  0x35   :  { %326 = vmatprep.subr.mxu1 %v91_v49  ;;  %292 = vmatpush3.msra.mxu0 %v43_v50 }
  0x36   :  { %327 = vmatpush3.msra.mxu1 %v75_v51  ;;  %293 = vmatprep.subr.mxu0 %v58_v52 }
  0x37   :  { %328 = vmatprep.subr.mxu1 %v90_v53  ;;  %294 = vmatpush3.msra.mxu0 %v42_v54 }
  0x38   :  { %329 = vmatpush3.msra.mxu1 %v74_v55  ;;  %295 = vmatprep.subr.mxu0 %v57_v57 }
  0x39   :  { %330 = vmatprep.subr.mxu1 %v89_v58  ;;  %296 = vmatpush3.msra.mxu0 %v41_v60 }
  0x3a   :  { %331 = vmatpush3.msra.mxu1 %v73_v61  ;;  %297 = vmatprep.subr.mxu0 %v56_v62 }
  0x3b   :  { %332 = vmatprep.subr.mxu1 %v88_v63  ;;  %298 = vmatpush3.msra.mxu0 %v40_v1 }
  0x3c   :  { %174 = vmatprep.mubr.f32.mxu0 %v106_v0  ;;  %333 = vmatpush3.msra.mxu1 %v72_v3 }
  0x3d   :  { %244 = vmatprep.mubr.f32.mxu1 %v107_v2  ;;  %175 = vmatmul.mubr.f32.vlgmr.msra.gmra.mxu0 %v38_v56 }
  0x3e   :  { %245 = vmatmul.mubr.f32.vlgmr.msra.gmra.mxu1 %v39_v59 }
  0xfd   :  { %v299_v4 = vpop.f32.mrf.mxu0 }
  0xfe   :  { %v334_v5 = vpop.f32.mrf.mxu1 }
  0xff   :  { %v300_v6 = vpop.f32.mrf.mxu0 }
 0x100   :  { %v335_v7 = vpop.f32.mrf.mxu1  ;;  %v301_v8 = vadd.f32 %v300_v6, %v299_v4 }
 0x101   :  { %v336_v9 = vadd.f32 %v335_v7, %v334_v5 }
 0x103   :  { %v247_v10 = vadd.f32 %v336_v9, %v301_v8 }
 0x105   :  { %250 = vst [vmem:[#allocation7] sm:$0xf] %v247_v10 }
 0x106   :  { %395 = shalt.err (!%p392_p0)
}
 0x107   :  { %260 = dma.vmem_to_hbm [thread:$0]  %s258_s1, 64, %s441_s2, [#allocation4]  }
 0x108   :  { %408 = dma.done.wait [#allocation4], 64  }
 0x109   :  { %409 = vsyncadd [#allocation4], 4294967232 }
 0x10a   :  { %264 = vsyncpa [#allocation3], 1 }
 0x10b   :  { %265 = vsyncpa [#allocation6], 1 }
 0x10c   :  { %266 = vsyncpa [#allocation4], 1 }

// kernel: tpu_custom_call.1
= control target key start
LH: loop header
LB: loop body
LE: loop exit
PB: predicated region body
PF: predicated region fallthrough
CT: control target
= control target key end

     0   :  { %7 = vsyncpa [#allocation3], 0  ;;  %s439_s0 = inlined_call_operand.hbm [shape: f32[4,512], index: 0, kind: input, shape index: {}]   ;;  %s440_s1 = inlined_call_operand.hbm [shape: f32[512,128], index: 1, kind: input, shape index: {}]   ;;  %s441_s2 = inlined_call_operand.hbm [shape: f32[4,128], index: 2, kind: output, shape index: {}]  }
   0x1   :  { %8 = vsyncpa [#allocation6], 0 }
   0x2   :  { %9 = vsyncpa [#allocation4], 0  ;;  %s410_s9 = smov [#allocation2]   ;;  %s411_s11 = smov [#allocation5]  }
   0x3   :  { %s16_s10 = sshll.u32 %s410_s9, 4  ;;  %s25_s12 = sshll.u32 %s411_s11, 4  ;;  %s17_s10 = int_to_ptr.vmem [resolvable:$true] %s16_s10  ;;  %s26_s12 = int_to_ptr.vmem [resolvable:$true] %s25_s12 }
   0x4   :  { %s352_s13 = scalar_lea.vmem %s17_s10, 256  ;;  %p357_p1 = scmp.lt.s32.totalorder %s17_s10, %s17_s10 }
   0x5   :  { %p353_p0 = scmp.ne.s32.totalorder %s17_s10, %s352_s13  ;;  %p358_p2 = scmp.lt.s32.totalorder %s352_s13, %s352_s13 }
   0x7   :  { %p359_p3 = por %p358_p2, %p357_p1 }
   0x9   :  { %p360_p4 = pnand %p359_p3, %p353_p0 }
   0xb   :  { %363 = shalt.err (!%p360_p4)
}
   0xc   :  { %19 = dma.hbm_to_vmem [thread:$0]  %s439_s0, 256, %s17_s10, [#allocation3]  }
   0xd   :  { %s372_s16 = scalar_lea.vmem %s26_s12, 8192  ;;  %p377_p6 = scmp.lt.s32.totalorder %s26_s12, %s26_s12 }
   0xe   :  { %p373_p5 = scmp.ne.s32.totalorder %s26_s12, %s372_s16  ;;  %p378_p7 = scmp.lt.s32.totalorder %s372_s16, %s372_s16 }
  0x10   :  { %p379_p8 = por %p378_p7, %p377_p6 }
  0x12   :  { %p380_p9 = pnand %p379_p8, %p373_p5 }
  0x14   :  { %383 = shalt.err (!%p380_p9)
}
  0x15   :  { %s412_s17 = smov 128   ;;  %s413_s18 = smov 8  }
  0x16   :  { %31 = dma.hbm_to_vmem [thread:$0]  %s440_s1, 8192, %s26_s12, [#allocation6], %s412_s17, %s412_s17, %s413_s18  }
  0x17   :  { %404 = dma.done.wait [#allocation3], 256  }
  0x18   :  { %405 = vsyncadd [#allocation3], 4294967040 }
  0x19   :  { %406 = dma.done.wait [#allocation6], 8192  }
  0x1a   :  { %407 = vsyncadd [#allocation6], 4294959104  ;;  %v71_v0 = vld [vmem:[#allocation5 + $0xf8] sm:$0xff]  ;;  %v70_v4 = vld [vmem:[#allocation5 + $0xf0] sm:$0xff]  ;;  %s414_s0 = smov [#allocation7]  }
  0x1b   :  { %v103_v1 = vld [vmem:[#allocation5 + $0x1f8] sm:$0xff]  ;;  %267 = vmatprep.subr.mxu0 %v71_v0  ;;  %v102_v5 = vld [vmem:[#allocation5 + $0x1f0] sm:$0xff]  ;;  %v69_v8 = vld [vmem:[#allocation5 + $0xe8] sm:$0xff]  ;;  %s257_s1 = sshll.u32 %s414_s0, 4  ;;  %s258_s1 = int_to_ptr.vmem [resolvable:$true] %s257_s1 }
  0x1c   :  { %v55_v2 = vld [vmem:[#allocation5 + $0x78] sm:$0xff]  ;;  %302 = vmatprep.subr.mxu1 %v103_v1  ;;  %v54_v6 = vld [vmem:[#allocation5 + $0x70] sm:$0xff]  ;;  %v101_v9 = vld [vmem:[#allocation5 + $0x1e8] sm:$0xff]  ;;  %s384_s21 = scalar_lea.vmem %s258_s1, 64  ;;  %p389_p11 = scmp.lt.s32.totalorder %s258_s1, %s258_s1 }
  0x1d   :  { %v87_v3 = vld [vmem:[#allocation5 + $0x178] sm:$0xff]  ;;  %268 = vmatpush3.msra.mxu0 %v55_v2  ;;  %v86_v7 = vld [vmem:[#allocation5 + $0x170] sm:$0xff]  ;;  %v53_v10 = vld [vmem:[#allocation5 + $0x68] sm:$0xff]  ;;  %p385_p10 = scmp.ne.s32.totalorder %s258_s1, %s384_s21  ;;  %p390_p12 = scmp.lt.s32.totalorder %s384_s21, %s384_s21 }
  0x1e   :  { %303 = vmatpush3.msra.mxu1 %v87_v3  ;;  %269 = vmatprep.subr.mxu0 %v70_v4  ;;  %v85_v11 = vld [vmem:[#allocation5 + $0x168] sm:$0xff]  ;;  %v68_v12 = vld [vmem:[#allocation5 + $0xe0] sm:$0xff]  ;;  %v67_v16 = vld [vmem:[#allocation5 + $0xd8] sm:$0xff] }
  0x1f   :  { %304 = vmatprep.subr.mxu1 %v102_v5  ;;  %270 = vmatpush3.msra.mxu0 %v54_v6  ;;  %v100_v13 = vld [vmem:[#allocation5 + $0x1e0] sm:$0xff]  ;;  %v99_v17 = vld [vmem:[#allocation5 + $0x1d8] sm:$0xff]  ;;  %v66_v20 = vld [vmem:[#allocation5 + $0xd0] sm:$0xff]  ;;  %p391_p13 = por %p390_p12, %p389_p11 }
  0x20   :  { %305 = vmatpush3.msra.mxu1 %v86_v7  ;;  %271 = vmatprep.subr.mxu0 %v69_v8  ;;  %v52_v14 = vld [vmem:[#allocation5 + $0x60] sm:$0xff]  ;;  %v51_v18 = vld [vmem:[#allocation5 + $0x58] sm:$0xff]  ;;  %v98_v21 = vld [vmem:[#allocation5 + $0x1d0] sm:$0xff] }
  0x21   :  { %306 = vmatprep.subr.mxu1 %v101_v9  ;;  %v84_v15 = vld [vmem:[#allocation5 + $0x160] sm:$0xff]  ;;  %272 = vmatpush3.msra.mxu0 %v53_v10  ;;  %v83_v19 = vld [vmem:[#allocation5 + $0x158] sm:$0xff]  ;;  %v50_v22 = vld [vmem:[#allocation5 + $0x50] sm:$0xff]  ;;  %p392_p0 = pnand %p391_p13, %p385_p10 }
  0x22   :  { %307 = vmatpush3.msra.mxu1 %v85_v11  ;;  %273 = vmatprep.subr.mxu0 %v68_v12  ;;  %v82_v23 = vld [vmem:[#allocation5 + $0x150] sm:$0xff]  ;;  %v65_v24 = vld [vmem:[#allocation5 + $0xc8] sm:$0xff]  ;;  %v64_v28 = vld [vmem:[#allocation5 + $0xc0] sm:$0xff] }
  0x23   :  { %308 = vmatprep.subr.mxu1 %v100_v13  ;;  %274 = vmatpush3.msra.mxu0 %v52_v14  ;;  %v97_v25 = vld [vmem:[#allocation5 + $0x1c8] sm:$0xff]  ;;  %v96_v29 = vld [vmem:[#allocation5 + $0x1c0] sm:$0xff]  ;;  %v63_v32 = vld [vmem:[#allocation5 + $0xb8] sm:$0xff] }
  0x24   :  { %309 = vmatpush3.msra.mxu1 %v84_v15  ;;  %275 = vmatprep.subr.mxu0 %v67_v16  ;;  %v49_v26 = vld [vmem:[#allocation5 + $0x48] sm:$0xff]  ;;  %v48_v30 = vld [vmem:[#allocation5 + $0x40] sm:$0xff]  ;;  %v95_v33 = vld [vmem:[#allocation5 + $0x1b8] sm:$0xff] }
  0x25   :  { %310 = vmatprep.subr.mxu1 %v99_v17  ;;  %276 = vmatpush3.msra.mxu0 %v51_v18  ;;  %v81_v27 = vld [vmem:[#allocation5 + $0x148] sm:$0xff]  ;;  %v80_v31 = vld [vmem:[#allocation5 + $0x140] sm:$0xff]  ;;  %v47_v34 = vld [vmem:[#allocation5 + $0x38] sm:$0xff] }
  0x26   :  { %311 = vmatpush3.msra.mxu1 %v83_v19  ;;  %277 = vmatprep.subr.mxu0 %v66_v20  ;;  %v79_v35 = vld [vmem:[#allocation5 + $0x138] sm:$0xff]  ;;  %v62_v36 = vld [vmem:[#allocation5 + $0xb0] sm:$0xff]  ;;  %v61_v40 = vld [vmem:[#allocation5 + $0xa8] sm:$0xff] }
  0x27   :  { %312 = vmatprep.subr.mxu1 %v98_v21  ;;  %278 = vmatpush3.msra.mxu0 %v50_v22  ;;  %v94_v37 = vld [vmem:[#allocation5 + $0x1b0] sm:$0xff]  ;;  %v93_v41 = vld [vmem:[#allocation5 + $0x1a8] sm:$0xff]  ;;  %v60_v44 = vld [vmem:[#allocation5 + $0xa0] sm:$0xff] }
  0x28   :  { %313 = vmatpush3.msra.mxu1 %v82_v23  ;;  %279 = vmatprep.subr.mxu0 %v65_v24  ;;  %v46_v38 = vld [vmem:[#allocation5 + $0x30] sm:$0xff]  ;;  %v45_v42 = vld [vmem:[#allocation5 + $0x28] sm:$0xff]  ;;  %v92_v45 = vld [vmem:[#allocation5 + $0x1a0] sm:$0xff] }
  0x29   :  { %314 = vmatprep.subr.mxu1 %v97_v25  ;;  %280 = vmatpush3.msra.mxu0 %v49_v26  ;;  %v78_v39 = vld [vmem:[#allocation5 + $0x130] sm:$0xff]  ;;  %v77_v43 = vld [vmem:[#allocation5 + $0x128] sm:$0xff]  ;;  %v44_v46 = vld [vmem:[#allocation5 + $0x20] sm:$0xff] }
  0x2a   :  { %315 = vmatpush3.msra.mxu1 %v81_v27  ;;  %281 = vmatprep.subr.mxu0 %v64_v28  ;;  %v76_v47 = vld [vmem:[#allocation5 + $0x120] sm:$0xff]  ;;  %v59_v48 = vld [vmem:[#allocation5 + $0x98] sm:$0xff]  ;;  %v58_v52 = vld [vmem:[#allocation5 + $0x90] sm:$0xff] }
  0x2b   :  { %316 = vmatprep.subr.mxu1 %v96_v29  ;;  %282 = vmatpush3.msra.mxu0 %v48_v30  ;;  %v91_v49 = vld [vmem:[#allocation5 + $0x198] sm:$0xff]  ;;  %v90_v53 = vld [vmem:[#allocation5 + $0x190] sm:$0xff]  ;;  %v57_v57 = vld [vmem:[#allocation5 + $0x88] sm:$0xff] }
  0x2c   :  { %317 = vmatpush3.msra.mxu1 %v80_v31  ;;  %283 = vmatprep.subr.mxu0 %v63_v32  ;;  %v43_v50 = vld [vmem:[#allocation5 + $0x18] sm:$0xff]  ;;  %v42_v54 = vld [vmem:[#allocation5 + $0x10] sm:$0xff]  ;;  %v89_v58 = vld [vmem:[#allocation5 + $0x188] sm:$0xff] }
  0x2d   :  { %318 = vmatprep.subr.mxu1 %v95_v33  ;;  %284 = vmatpush3.msra.mxu0 %v47_v34  ;;  %v75_v51 = vld [vmem:[#allocation5 + $0x118] sm:$0xff]  ;;  %v74_v55 = vld [vmem:[#allocation5 + $0x110] sm:$0xff]  ;;  %v41_v60 = vld [vmem:[#allocation5 + $0x8] sm:$0xff] }
  0x2e   :  { %319 = vmatpush3.msra.mxu1 %v79_v35  ;;  %285 = vmatprep.subr.mxu0 %v62_v36  ;;  %v38_v56 = vld [vmem:[#allocation2] sm:$0xff]  ;;  %v39_v59 = vld [vmem:[#allocation2 + $0x8] sm:$0xff]  ;;  %v73_v61 = vld [vmem:[#allocation5 + $0x108] sm:$0xff] }
  0x2f   :  { %320 = vmatprep.subr.mxu1 %v94_v37  ;;  %286 = vmatpush3.msra.mxu0 %v46_v38  ;;  %v56_v62 = vld [vmem:[#allocation5 + $0x80] sm:$0xff]  ;;  %v106_v0 = vcombine.high %v38_v56, %v38_v56  ;;  %v107_v2 = vcombine.high %v39_v59, %v39_v59 }
  0x30   :  { %321 = vmatpush3.msra.mxu1 %v78_v39  ;;  %287 = vmatprep.subr.mxu0 %v61_v40  ;;  %v88_v63 = vld [vmem:[#allocation5 + $0x180] sm:$0xff] }
  0x31   :  { %322 = vmatprep.subr.mxu1 %v93_v41  ;;  %288 = vmatpush3.msra.mxu0 %v45_v42  ;;  %v40_v1 = vld [vmem:[#allocation5] sm:$0xff] }
  0x32   :  { %323 = vmatpush3.msra.mxu1 %v77_v43  ;;  %289 = vmatprep.subr.mxu0 %v60_v44  ;;  %v72_v3 = vld [vmem:[#allocation5 + $0x100] sm:$0xff] }
  0x33   :  { %324 = vmatprep.subr.mxu1 %v92_v45  ;;  %290 = vmatpush3.msra.mxu0 %v44_v46 }
  0x34   :  { %325 = vmatpush3.msra.mxu1 %v76_v47  ;;  %291 = vmatprep.subr.mxu0 %v59_v48 }
  0x35   :  { %326 = vmatprep.subr.mxu1 %v91_v49  ;;  %292 = vmatpush3.msra.mxu0 %v43_v50 }
  0x36   :  { %327 = vmatpush3.msra.mxu1 %v75_v51  ;;  %293 = vmatprep.subr.mxu0 %v58_v52 }
  0x37   :  { %328 = vmatprep.subr.mxu1 %v90_v53  ;;  %294 = vmatpush3.msra.mxu0 %v42_v54 }
  0x38   :  { %329 = vmatpush3.msra.mxu1 %v74_v55  ;;  %295 = vmatprep.subr.mxu0 %v57_v57 }
  0x39   :  { %330 = vmatprep.subr.mxu1 %v89_v58  ;;  %296 = vmatpush3.msra.mxu0 %v41_v60 }
  0x3a   :  { %331 = vmatpush3.msra.mxu1 %v73_v61  ;;  %297 = vmatprep.subr.mxu0 %v56_v62 }
  0x3b   :  { %332 = vmatprep.subr.mxu1 %v88_v63  ;;  %298 = vmatpush3.msra.mxu0 %v40_v1 }
  0x3c   :  { %174 = vmatprep.mubr.f32.mxu0 %v106_v0  ;;  %333 = vmatpush3.msra.mxu1 %v72_v3 }
  0x3d   :  { %244 = vmatprep.mubr.f32.mxu1 %v107_v2  ;;  %175 = vmatmul.mubr.f32.vlgmr.msra.gmra.mxu0 %v38_v56 }
  0x3e   :  { %245 = vmatmul.mubr.f32.vlgmr.msra.gmra.mxu1 %v39_v59 }
  0xfd   :  { %v299_v4 = vpop.f32.mrf.mxu0 }
  0xfe   :  { %v334_v5 = vpop.f32.mrf.mxu1 }
  0xff   :  { %v300_v6 = vpop.f32.mrf.mxu0 }
 0x100   :  { %v335_v7 = vpop.f32.mrf.mxu1  ;;  %v301_v8 = vadd.f32 %v300_v6, %v299_v4 }
 0x101   :  { %v336_v9 = vadd.f32 %v335_v7, %v334_v5 }
 0x103   :  { %v247_v10 = vadd.f32 %v336_v9, %v301_v8 }
 0x105   :  { %250 = vst [vmem:[#allocation7] sm:$0xf] %v247_v10 }
 0x106   :  { %395 = shalt.err (!%p392_p0)
}
 0x107   :  { %260 = dma.vmem_to_hbm [thread:$0]  %s258_s1, 64, %s441_s2, [#allocation4]  }
 0x108   :  { %408 = dma.done.wait [#allocation4], 64  }
 0x109   :  { %409 = vsyncadd [#allocation4], 4294967232 }
 0x10a   :  { %264 = vsyncpa [#allocation3], 1 }
 0x10b   :  { %265 = vsyncpa [#allocation6], 1 }
 0x10c   :  { %266 = vsyncpa [#allocation4], 1 }

</bundles_post_ra>
